<compile_context>
chip_gen: v6e
topology: v6e:2x2x1
jax: 0.10.0
libtpu: 0.0.40
codegen_flags: <defaults>
</compile_context>

<pallas_src>
import functools

import jax
import jax.numpy as jnp
from jax.experimental import pallas as pl
from jax.experimental.pallas import tpu as pltpu

MAX_BM = 256  # M-tile for the dense kernel when M is large

TAPS_3x3 = tuple((di, dj) for di in range(3) for dj in range(3))
TAPS_2x2 = ((0, 0), (0, 1), (1, 0), (1, 1))


# ----------------------------------------------------------------------------
# Dense kernel: out = A @ W + b (optional ReLU).  Full-extent K and N blocks
# (no pad-to-128, no K reduction axis, no scratch); only M is tiled.
# ----------------------------------------------------------------------------
def _linear_kernel(a_ref, w_ref, b_ref, o_ref, *, relu):
    out = jnp.dot(a_ref[...], w_ref[...], preferred_element_type=jnp.float32)
    out = out + b_ref[...]
    if relu:
        out = jnp.maximum(out, 0.0)
    o_ref[...] = out.astype(o_ref.dtype)


def pallas_linear(a, w, b, relu=False):
    """a: (M, K); w: (K, N); b: (1, N)."""
    a = a.astype(jnp.float32)
    M, K = a.shape
    K2, N = w.shape
    assert K == K2 and b.shape == (1, N)

    if M <= MAX_BM:
        bm, Mp, a_p = M, M, a                 # full-extent M block: no padding
    else:
        bm = MAX_BM
        Mp = pl.cdiv(M, bm) * bm
        a_p = a if Mp == M else jnp.pad(a, ((0, Mp - M), (0, 0)))

    out = pl.pallas_call(
        functools.partial(_linear_kernel, relu=relu),
        out_shape=jax.ShapeDtypeStruct((Mp, N), jnp.float32),
        grid=(Mp // bm,),
        in_specs=[
            pl.BlockSpec((bm, K), lambda i: (i, 0)),
            pl.BlockSpec((K, N), lambda i: (0, 0)),
            pl.BlockSpec((1, N), lambda i: (0, 0)),
        ],
        out_specs=pl.BlockSpec((bm, N), lambda i: (i, 0)),
        compiler_params=pltpu.CompilerParams(
            dimension_semantics=("parallel",)),
    )(a_p, w, b)
    return out if Mp == M else out[:M]


# ----------------------------------------------------------------------------
# Conv kernel: accumulate T shifted-window tap matmuls fully in VMEM.
# ----------------------------------------------------------------------------
def _tap_conv_kernel(x_ref, w_ref, b_ref, o_ref, *, taps, out_h, out_w, relu):
    """x_ref: (1, Hi, Wi, Cin); w_ref: (T, Cin, Cout); b_ref: (1, Cout);
    o_ref: (out_h*out_w, Cout).  No im2col tensor is ever materialized in HBM."""
    cin = x_ref.shape[-1]
    acc = None
    for t, (di, dj) in enumerate(taps):
        win = x_ref[0, di:di + out_h, dj:dj + out_w, :]       # (out_h, out_w, Cin)
        win2d = win.reshape(out_h * out_w, cin)
        part = jnp.dot(win2d, w_ref[t], preferred_element_type=jnp.float32)
        acc = part if acc is None else acc + part
    out = acc + b_ref[...]
    if relu:
        out = jnp.maximum(out, 0.0)
    o_ref[...] = out.astype(o_ref.dtype)


def _tap_conv(x, w_taps, b, taps, out_hw, relu):
    B, Hi, Wi, Cin = x.shape
    T, Cin2, Cout = w_taps.shape
    assert Cin == Cin2 and len(taps) == T
    Ho, Wo = out_hw
    out = pl.pallas_call(
        functools.partial(_tap_conv_kernel, taps=tuple(taps),
                          out_h=Ho, out_w=Wo, relu=relu),
        out_shape=jax.ShapeDtypeStruct((B * Ho * Wo, Cout), jnp.float32),
        grid=(B,),
        in_specs=[
            pl.BlockSpec((1, Hi, Wi, Cin), lambda bi: (bi, 0, 0, 0)),
            pl.BlockSpec((T, Cin, Cout), lambda bi: (0, 0, 0)),
            pl.BlockSpec((1, Cout), lambda bi: (0, 0)),
        ],
        out_specs=pl.BlockSpec((Ho * Wo, Cout), lambda bi: (bi, 0)),
        compiler_params=pltpu.CompilerParams(
            dimension_semantics=("parallel",)),
    )(x.astype(jnp.float32), w_taps, b)
    return out.reshape(B, Ho, Wo, Cout)


def _space_to_depth2(x):
    """(B, H, W, C) with even H, W -> (B, H//2, W//2, 4C); channel=(pi*2+pj)*C+c."""
    B, H, W, C = x.shape
    x = x.reshape(B, H // 2, 2, W // 2, 2, C)
    x = jnp.transpose(x, (0, 1, 3, 2, 4, 5))
    return x.reshape(B, H // 2, W // 2, 4 * C)


def conv3x3_s1(x, w_taps, b, relu=True):
    """'same' 3x3 stride-1 conv; w_taps: (9, Cin, Cout), packed at init."""
    B, H, W, C = x.shape
    x_p = jnp.pad(x, ((0, 0), (1, 1), (1, 1), (0, 0)))
    return _tap_conv(x_p, w_taps, b, TAPS_3x3, (H, W), relu)


def conv3x3_s2(x, w_taps, b, relu=True):
    """'same' 3x3 stride-2 conv; w_taps: (4, 4*Cin, Cout), packed at init.
    The padded input is viewed via space-to-depth(2), turning the strided conv
    into 4 contiguous taps (no strided / duplicated activation in HBM)."""
    B, H, W, C = x.shape                       # H, W even
    x_p = jnp.pad(x, ((0, 0), (1, 1), (1, 1), (0, 0)))
    s = _space_to_depth2(x_p)                  # (B, H//2+1, W//2+1, 4C)
    return _tap_conv(s, w_taps, b, TAPS_2x2, (H // 2, W // 2), relu)


# ----------------------------------------------------------------------------
# Fused latent head: one matmul for [z_mean | z_log_var] + reparameterization.
# ----------------------------------------------------------------------------
def _latent_kernel(x_ref, w_ref, b_ref, eps_ref, mean_ref, logvar_ref, z_ref,
                   *, latent_dim):
    h = jnp.dot(x_ref[...], w_ref[...], preferred_element_type=jnp.float32)
    h = h + b_ref[...]
    mean = h[:, :latent_dim]
    log_var = h[:, latent_dim:]
    mean_ref[...] = mean
    logvar_ref[...] = log_var
    # rsample of Normal(mu, exp(0.5 * log_var))
    z_ref[...] = mean + jnp.exp(0.5 * log_var) * eps_ref[...]


def latent_head(flat, w_cat, b_cat, eps):
    B, F = flat.shape
    L = eps.shape[-1]
    out_sds = jax.ShapeDtypeStruct((B, L), jnp.float32)
    return pl.pallas_call(
        functools.partial(_latent_kernel, latent_dim=L),
        out_shape=(out_sds, out_sds, out_sds),
        grid=(1,),
        in_specs=[
            pl.BlockSpec((B, F), lambda i: (0, 0)),
            pl.BlockSpec((F, 2 * L), lambda i: (0, 0)),
            pl.BlockSpec((1, 2 * L), lambda i: (0, 0)),
            pl.BlockSpec((B, L), lambda i: (0, 0)),
        ],
        out_specs=(pl.BlockSpec((B, L), lambda i: (0, 0)),
                   pl.BlockSpec((B, L), lambda i: (0, 0)),
                   pl.BlockSpec((B, L), lambda i: (0, 0))),
        compiler_params=pltpu.CompilerParams(
            dimension_semantics=("parallel",)),
    )(flat.astype(jnp.float32), w_cat, b_cat, eps)


# ----------------------------------------------------------------------------
# Weight packing (done once at init).
# ----------------------------------------------------------------------------
def _stride1_tap_weights(w):
    """(3, 3, Cin, Cout) -> (9, Cin, Cout); tap order di*3 + dj."""
    k, _, cin, cout = w.shape
    return w.reshape(k * k, cin, cout)


def _stride2_tap_weights(w):
    """(3, 3, Cin, Cout) -> (4, 4*Cin, Cout) effective weights over the
    space-to-depth(2) input; tap = oi*2 + oj, with di = 2*oi + pi, dj = 2*oj + pj."""
    _, _, cin, cout = w.shape
    w_eff = jnp.zeros((2, 2, 2, 2, cin, cout), w.dtype)
    for di in range(3):
        for dj in range(3):
            w_eff = w_eff.at[di // 2, dj // 2, di % 2, dj % 2].set(w[di, dj])
    return w_eff.reshape(4, 4 * cin, cout)


def upsample2x(x):
    # TODO(synk): fuse the nearest-neighbor upsample into the following conv's
    # window reads instead of materializing the 4x activation tensor.
    return jnp.repeat(jnp.repeat(x, 2, axis=1), 2, axis=2)


# ----------------------------------------------------------------------------
# VAE parameters / forward
# ----------------------------------------------------------------------------
def init_vae_params(key, in_ch, H, W, latent_dim, enc_filters, dec_filters):
    """All weights are stored in their kernel (matmul) layouts, built once here."""
    params = {"enc_convs": [], "dec_convs": []}
    k = key

    def nrm(kk, shape, scale=0.05):
        return scale * jax.random.normal(kk, shape, dtype=jnp.float32)

    # encoder: [3x3 stride-2 conv + ReLU] per filter spec
    c = in_ch
    for f in enc_filters:
        k, k1 = jax.random.split(k)
        w = nrm(k1, (3, 3, c, f))
        params["enc_convs"].append((_stride2_tap_weights(w),
                                    jnp.zeros((1, f), jnp.float32)))
        c = f
    Hf, Wf = H // (2 ** len(enc_filters)), W // (2 ** len(enc_filters))
    flat = Hf * Wf * c

    # fused latent head: concat(mean, logvar) weights along N
    k, k1, k2 = jax.random.split(k, 3)
    w_cat = jnp.concatenate([nrm(k1, (flat, latent_dim)),
                             nrm(k2, (flat, latent_dim))], axis=1)
    params["fc_latent"] = (w_cat, jnp.zeros((1, 2 * latent_dim), jnp.float32))

    # decoder: linear -> (Hf, Wf, c_dec) -> [2x upsample + 3x3 conv + ReLU]*N -> conv out
    c_dec = dec_filters[-1]
    k, k1 = jax.random.split(k)
    params["fc_dec"] = (nrm(k1, (latent_dim, Hf * Wf * c_dec)),
                        jnp.zeros((1, Hf * Wf * c_dec), jnp.float32))
    c = c_dec
    for f in reversed(dec_filters):
        k, k1 = jax.random.split(k)
        w = nrm(k1, (3, 3, c, f))
        params["dec_convs"].append((_stride1_tap_weights(w),
                                    jnp.zeros((1, f), jnp.float32)))
        c = f
    k, k1 = jax.random.split(k)
    w = nrm(k1, (3, 3, c, in_ch))
    params["conv_out"] = (_stride1_tap_weights(w),
                          jnp.zeros((1, in_ch), jnp.float32))
    params["shapes"] = (Hf, Wf, c_dec)
    params["latent_dim"] = latent_dim
    return params


def vae_forward(params, x_nchw, eps_key):
    """Forward pass of the VAE.  Input/output are NCHW to mirror PyTorch."""
    x = jnp.transpose(x_nchw, (0, 2, 3, 1)).astype(jnp.float32)   # -> NHWC
    B = x.shape[0]

    # ---- encoder ----
    for w, b in params["enc_convs"]:
        x = conv3x3_s2(x, w, b, relu=True)
    flat = x.reshape(B, -1)

    # ---- fused z_mean / z_log_var / reparameterization ----
    eps = jax.random.normal(eps_key, (B, params["latent_dim"]), dtype=jnp.float32)
    z_mean, z_log_var, z = latent_head(flat, *params["fc_latent"], eps)

    # ---- decoder ----
    Hf, Wf, c_dec = params["shapes"]
    h = pallas_linear(z, *params["fc_dec"], relu=True).reshape(B, Hf, Wf, c_dec)
    for w, b in params["dec_convs"]:
        h = upsample2x(h)
        h = conv3x3_s1(h, w, b, relu=True)
    x_rec = conv3x3_s1(h, *params["conv_out"], relu=False)

    return jnp.transpose(x_rec, (0, 3, 1, 2)), z_mean, z_log_var, z


if __name__ == "__main__":
    key = jax.random.PRNGKey(0)
    k_x, k_p, k_eps, k_t1, k_t2 = jax.random.split(key, 5)

    # --- quick numerical check of the tap-conv kernels against XLA conv ---
    xt = jax.random.normal(k_t1, (2, 8, 8, 4), jnp.float32)
    wt = 0.1 * jax.random.normal(k_t2, (3, 3, 4, 8), jnp.float32)
    bt = jnp.zeros((1, 8), jnp.float32)
    ref1 = jax.lax.conv_general_dilated(
        xt, wt, (1, 1), ((1, 1), (1, 1)),
        dimension_numbers=("NHWC", "HWIO", "NHWC"))
    got1 = conv3x3_s1(xt, _stride1_tap_weights(wt), bt, relu=False)
    ref2 = jax.lax.conv_general_dilated(
        xt, wt, (2, 2), ((1, 1), (1, 1)),
        dimension_numbers=("NHWC", "HWIO", "NHWC"))
    got2 = conv3x3_s2(xt, _stride2_tap_weights(wt), bt, relu=False)
    assert jnp.allclose(got1, ref1, rtol=1e-4, atol=1e-4)
    assert jnp.allclose(got2, ref2, rtol=1e-4, atol=1e-4)

    # --- full VAE forward ---
    B, C, H, W = 2, 4, 16, 16
    latent_dim = 8
    enc_filters = [8, 16]   # small stand-ins for encoder_architecture filters
    dec_filters = [8, 16]   # small stand-ins for decoder_architecture filters

    x = jax.random.normal(k_x, (B, C, H, W), dtype=jnp.float32)
    params = init_vae_params(k_p, C, H, W, latent_dim, enc_filters, dec_filters)

    fwd = jax.jit(functools.partial(vae_forward, params))
    x_rec, z_mean, z_log_var, z = fwd(x, k_eps)
    jax.block_until_ready((x_rec, z_mean, z_log_var, z))

    assert x_rec.shape == (B, C, H, W)
    assert z_mean.shape == (B, latent_dim)
    assert z_log_var.shape == (B, latent_dim)
    assert z.shape == (B, latent_dim)
    print("KERNEL_OK")
</pallas_src>

<mosaic_0001>
module attributes {stable_mosaic.version = 11 : i64} {
  func.func @_tap_conv_kernel(%arg0: i32, %arg1: memref<1x10x10x4xf32, #tpu.memory_space<vmem>>, %arg2: memref<9x4x8xf32, #tpu.memory_space<vmem>>, %arg3: memref<1x8xf32, #tpu.memory_space<vmem>>, %arg4: memref<64x8xf32, #tpu.memory_space<vmem>>) attributes {dimension_semantics = [#tpu.dimension_semantics<parallel>], iteration_bounds = array<i64: 2>, scalar_prefetch = 0 : i64, scratch_operands = 0 : i64, tpu.core_type = #tpu.core_type<tc>, window_params = [{transform_indices = @transform_0, window_bounds = array<i64: 1, 10, 10, 4>}, {pipeline_mode = #tpu.pipeline_mode<synchronous>, transform_indices = @transform_1, window_bounds = array<i64: 9, 4, 8>}, {pipeline_mode = #tpu.pipeline_mode<synchronous>, transform_indices = @transform_2, window_bounds = array<i64: 1, 8>}, {transform_indices = @transform_3, window_bounds = array<i64: 64, 8>}]} {
    %c0 = arith.constant 0 : index
    %c0_0 = arith.constant 0 : index
    %c0_1 = arith.constant 0 : index
    %c0_2 = arith.constant 0 : index
    %0 = vector.load %arg1[%c0, %c0_0, %c0_1, %c0_2] : memref<1x10x10x4xf32, #tpu.memory_space<vmem>>, vector<1x8x8x4xf32>
    %1 = vector.shape_cast %0 : vector<1x8x8x4xf32> to vector<8x8x4xf32>
    %2 = vector.shape_cast %1 : vector<8x8x4xf32> to vector<64x4xf32>
    %c0_3 = arith.constant 0 : index
    %c0_4 = arith.constant 0 : index
    %c0_5 = arith.constant 0 : index
    %3 = vector.load %arg2[%c0_3, %c0_4, %c0_5] : memref<9x4x8xf32, #tpu.memory_space<vmem>>, vector<1x4x8xf32>
    %4 = vector.shape_cast %3 : vector<1x4x8xf32> to vector<4x8xf32>
    %cst = arith.constant dense<0.000000e+00> : vector<64x8xf32>
    %5 = tpu.matmul %2, %4, %cst {dimension_numbers = #tpu.dot_dimension_numbers<[1], [0], [0], [1], [0, 0, 1, 1], [], []>} : vector<64x4xf32>, vector<4x8xf32>, vector<64x8xf32> -> vector<64x8xf32>
    %c0_6 = arith.constant 0 : index
    %c0_7 = arith.constant 0 : index
    %c1 = arith.constant 1 : index
    %c0_8 = arith.constant 0 : index
    %6 = vector.load %arg1[%c0_6, %c0_7, %c1, %c0_8] : memref<1x10x10x4xf32, #tpu.memory_space<vmem>>, vector<1x8x8x4xf32>
    %7 = vector.shape_cast %6 : vector<1x8x8x4xf32> to vector<8x8x4xf32>
    %8 = vector.shape_cast %7 : vector<8x8x4xf32> to vector<64x4xf32>
    %c1_9 = arith.constant 1 : index
    %c0_10 = arith.constant 0 : index
    %c0_11 = arith.constant 0 : index
    %9 = vector.load %arg2[%c1_9, %c0_10, %c0_11] : memref<9x4x8xf32, #tpu.memory_space<vmem>>, vector<1x4x8xf32>
    %10 = vector.shape_cast %9 : vector<1x4x8xf32> to vector<4x8xf32>
    %cst_12 = arith.constant dense<0.000000e+00> : vector<64x8xf32>
    %11 = tpu.matmul %8, %10, %cst_12 {dimension_numbers = #tpu.dot_dimension_numbers<[1], [0], [0], [1], [0, 0, 1, 1], [], []>} : vector<64x4xf32>, vector<4x8xf32>, vector<64x8xf32> -> vector<64x8xf32>
    %12 = arith.addf %5, %11 : vector<64x8xf32>
    %c0_13 = arith.constant 0 : index
    %c0_14 = arith.constant 0 : index
    %c2 = arith.constant 2 : index
    %c0_15 = arith.constant 0 : index
    %13 = vector.load %arg1[%c0_13, %c0_14, %c2, %c0_15] : memref<1x10x10x4xf32, #tpu.memory_space<vmem>>, vector<1x8x8x4xf32>
    %14 = vector.shape_cast %13 : vector<1x8x8x4xf32> to vector<8x8x4xf32>
    %15 = vector.shape_cast %14 : vector<8x8x4xf32> to vector<64x4xf32>
    %c2_16 = arith.constant 2 : index
    %c0_17 = arith.constant 0 : index
    %c0_18 = arith.constant 0 : index
    %16 = vector.load %arg2[%c2_16, %c0_17, %c0_18] : memref<9x4x8xf32, #tpu.memory_space<vmem>>, vector<1x4x8xf32>
    %17 = vector.shape_cast %16 : vector<1x4x8xf32> to vector<4x8xf32>
    %cst_19 = arith.constant dense<0.000000e+00> : vector<64x8xf32>
    %18 = tpu.matmul %15, %17, %cst_19 {dimension_numbers = #tpu.dot_dimension_numbers<[1], [0], [0], [1], [0, 0, 1, 1], [], []>} : vector<64x4xf32>, vector<4x8xf32>, vector<64x8xf32> -> vector<64x8xf32>
    %19 = arith.addf %12, %18 : vector<64x8xf32>
    %c0_20 = arith.constant 0 : index
    %c1_21 = arith.constant 1 : index
    %c0_22 = arith.constant 0 : index
    %c0_23 = arith.constant 0 : index
    %20 = vector.load %arg1[%c0_20, %c1_21, %c0_22, %c0_23] : memref<1x10x10x4xf32, #tpu.memory_space<vmem>>, vector<1x8x8x4xf32>
    %21 = vector.shape_cast %20 : vector<1x8x8x4xf32> to vector<8x8x4xf32>
    %22 = vector.shape_cast %21 : vector<8x8x4xf32> to vector<64x4xf32>
    %c3 = arith.constant 3 : index
    %c0_24 = arith.constant 0 : index
    %c0_25 = arith.constant 0 : index
    %23 = vector.load %arg2[%c3, %c0_24, %c0_25] : memref<9x4x8xf32, #tpu.memory_space<vmem>>, vector<1x4x8xf32>
    %24 = vector.shape_cast %23 : vector<1x4x8xf32> to vector<4x8xf32>
    %cst_26 = arith.constant dense<0.000000e+00> : vector<64x8xf32>
    %25 = tpu.matmul %22, %24, %cst_26 {dimension_numbers = #tpu.dot_dimension_numbers<[1], [0], [0], [1], [0, 0, 1, 1], [], []>} : vector<64x4xf32>, vector<4x8xf32>, vector<64x8xf32> -> vector<64x8xf32>
    %26 = arith.addf %19, %25 : vector<64x8xf32>
    %c0_27 = arith.constant 0 : index
    %c1_28 = arith.constant 1 : index
    %c1_29 = arith.constant 1 : index
    %c0_30 = arith.constant 0 : index
    %27 = vector.load %arg1[%c0_27, %c1_28, %c1_29, %c0_30] : memref<1x10x10x4xf32, #tpu.memory_space<vmem>>, vector<1x8x8x4xf32>
    %28 = vector.shape_cast %27 : vector<1x8x8x4xf32> to vector<8x8x4xf32>
    %29 = vector.shape_cast %28 : vector<8x8x4xf32> to vector<64x4xf32>
    %c4 = arith.constant 4 : index
    %c0_31 = arith.constant 0 : index
    %c0_32 = arith.constant 0 : index
    %30 = vector.load %arg2[%c4, %c0_31, %c0_32] : memref<9x4x8xf32, #tpu.memory_space<vmem>>, vector<1x4x8xf32>
    %31 = vector.shape_cast %30 : vector<1x4x8xf32> to vector<4x8xf32>
    %cst_33 = arith.constant dense<0.000000e+00> : vector<64x8xf32>
    %32 = tpu.matmul %29, %31, %cst_33 {dimension_numbers = #tpu.dot_dimension_numbers<[1], [0], [0], [1], [0, 0, 1, 1], [], []>} : vector<64x4xf32>, vector<4x8xf32>, vector<64x8xf32> -> vector<64x8xf32>
    %33 = arith.addf %26, %32 : vector<64x8xf32>
    %c0_34 = arith.constant 0 : index
    %c1_35 = arith.constant 1 : index
    %c2_36 = arith.constant 2 : index
    %c0_37 = arith.constant 0 : index
    %34 = vector.load %arg1[%c0_34, %c1_35, %c2_36, %c0_37] : memref<1x10x10x4xf32, #tpu.memory_space<vmem>>, vector<1x8x8x4xf32>
    %35 = vector.shape_cast %34 : vector<1x8x8x4xf32> to vector<8x8x4xf32>
    %36 = vector.shape_cast %35 : vector<8x8x4xf32> to vector<64x4xf32>
    %c5 = arith.constant 5 : index
    %c0_38 = arith.constant 0 : index
    %c0_39 = arith.constant 0 : index
    %37 = vector.load %arg2[%c5, %c0_38, %c0_39] : memref<9x4x8xf32, #tpu.memory_space<vmem>>, vector<1x4x8xf32>
    %38 = vector.shape_cast %37 : vector<1x4x8xf32> to vector<4x8xf32>
    %cst_40 = arith.constant dense<0.000000e+00> : vector<64x8xf32>
    %39 = tpu.matmul %36, %38, %cst_40 {dimension_numbers = #tpu.dot_dimension_numbers<[1], [0], [0], [1], [0, 0, 1, 1], [], []>} : vector<64x4xf32>, vector<4x8xf32>, vector<64x8xf32> -> vector<64x8xf32>
    %40 = arith.addf %33, %39 : vector<64x8xf32>
    %c0_41 = arith.constant 0 : index
    %c2_42 = arith.constant 2 : index
    %c0_43 = arith.constant 0 : index
    %c0_44 = arith.constant 0 : index
    %41 = vector.load %arg1[%c0_41, %c2_42, %c0_43, %c0_44] : memref<1x10x10x4xf32, #tpu.memory_space<vmem>>, vector<1x8x8x4xf32>
    %42 = vector.shape_cast %41 : vector<1x8x8x4xf32> to vector<8x8x4xf32>
    %43 = vector.shape_cast %42 : vector<8x8x4xf32> to vector<64x4xf32>
    %c6 = arith.constant 6 : index
    %c0_45 = arith.constant 0 : index
    %c0_46 = arith.constant 0 : index
    %44 = vector.load %arg2[%c6, %c0_45, %c0_46] : memref<9x4x8xf32, #tpu.memory_space<vmem>>, vector<1x4x8xf32>
    %45 = vector.shape_cast %44 : vector<1x4x8xf32> to vector<4x8xf32>
    %cst_47 = arith.constant dense<0.000000e+00> : vector<64x8xf32>
    %46 = tpu.matmul %43, %45, %cst_47 {dimension_numbers = #tpu.dot_dimension_numbers<[1], [0], [0], [1], [0, 0, 1, 1], [], []>} : vector<64x4xf32>, vector<4x8xf32>, vector<64x8xf32> -> vector<64x8xf32>
    %47 = arith.addf %40, %46 : vector<64x8xf32>
    %c0_48 = arith.constant 0 : index
    %c2_49 = arith.constant 2 : index
    %c1_50 = arith.constant 1 : index
    %c0_51 = arith.constant 0 : index
    %48 = vector.load %arg1[%c0_48, %c2_49, %c1_50, %c0_51] : memref<1x10x10x4xf32, #tpu.memory_space<vmem>>, vector<1x8x8x4xf32>
    %49 = vector.shape_cast %48 : vector<1x8x8x4xf32> to vector<8x8x4xf32>
    %50 = vector.shape_cast %49 : vector<8x8x4xf32> to vector<64x4xf32>
    %c7 = arith.constant 7 : index
    %c0_52 = arith.constant 0 : index
    %c0_53 = arith.constant 0 : index
    %51 = vector.load %arg2[%c7, %c0_52, %c0_53] : memref<9x4x8xf32, #tpu.memory_space<vmem>>, vector<1x4x8xf32>
    %52 = vector.shape_cast %51 : vector<1x4x8xf32> to vector<4x8xf32>
    %cst_54 = arith.constant dense<0.000000e+00> : vector<64x8xf32>
    %53 = tpu.matmul %50, %52, %cst_54 {dimension_numbers = #tpu.dot_dimension_numbers<[1], [0], [0], [1], [0, 0, 1, 1], [], []>} : vector<64x4xf32>, vector<4x8xf32>, vector<64x8xf32> -> vector<64x8xf32>
    %54 = arith.addf %47, %53 : vector<64x8xf32>
    %c0_55 = arith.constant 0 : index
    %c2_56 = arith.constant 2 : index
    %c2_57 = arith.constant 2 : index
    %c0_58 = arith.constant 0 : index
    %55 = vector.load %arg1[%c0_55, %c2_56, %c2_57, %c0_58] : memref<1x10x10x4xf32, #tpu.memory_space<vmem>>, vector<1x8x8x4xf32>
    %56 = vector.shape_cast %55 : vector<1x8x8x4xf32> to vector<8x8x4xf32>
    %57 = vector.shape_cast %56 : vector<8x8x4xf32> to vector<64x4xf32>
    %c8 = arith.constant 8 : index
    %c0_59 = arith.constant 0 : index
    %c0_60 = arith.constant 0 : index
    %58 = vector.load %arg2[%c8, %c0_59, %c0_60] : memref<9x4x8xf32, #tpu.memory_space<vmem>>, vector<1x4x8xf32>
    %59 = vector.shape_cast %58 : vector<1x4x8xf32> to vector<4x8xf32>
    %cst_61 = arith.constant dense<0.000000e+00> : vector<64x8xf32>
    %60 = tpu.matmul %57, %59, %cst_61 {dimension_numbers = #tpu.dot_dimension_numbers<[1], [0], [0], [1], [0, 0, 1, 1], [], []>} : vector<64x4xf32>, vector<4x8xf32>, vector<64x8xf32> -> vector<64x8xf32>
    %61 = arith.addf %54, %60 : vector<64x8xf32>
    %c0_62 = arith.constant 0 : index
    %c0_63 = arith.constant 0 : index
    %62 = vector.load %arg3[%c0_62, %c0_63] : memref<1x8xf32, #tpu.memory_space<vmem>>, vector<1x8xf32>
    %63 = vector.broadcast %62 : vector<1x8xf32> to vector<64x8xf32>
    %64 = arith.addf %61, %63 : vector<64x8xf32>
    %c0_64 = arith.constant 0 : index
    %c0_65 = arith.constant 0 : index
    %65 = vector.load %arg4[%c0_64, %c0_65] : memref<64x8xf32, #tpu.memory_space<vmem>>, vector<64x8xf32>
    tpu.vector_store %arg4[%c0_64, %c0_65], %64 {strides = array<i32>} : memref<64x8xf32, #tpu.memory_space<vmem>>, vector<64x8xf32>,
    return
  }
  func.func @transform_0(%arg0: i32) -> (i32, i32, i32, i32) {
    %c0_i32 = arith.constant 0 : i32
    %c0_i32_0 = arith.constant 0 : i32
    %c0_i32_1 = arith.constant 0 : i32
    %c0_i32_2 = arith.constant 0 : i32
    return %arg0, %c0_i32, %c0_i32_0, %c0_i32_1 : i32, i32, i32, i32
  }
  func.func @transform_1(%arg0: i32) -> (i32, i32, i32) {
    %c0_i32 = arith.constant 0 : i32
    %c0_i32_0 = arith.constant 0 : i32
    %c0_i32_1 = arith.constant 0 : i32
    %c0_i32_2 = arith.constant 0 : i32
    return %c0_i32, %c0_i32_0, %c0_i32_1 : i32, i32, i32
  }
  func.func @transform_2(%arg0: i32) -> (i32, i32) {
    %c0_i32 = arith.constant 0 : i32
    %c0_i32_0 = arith.constant 0 : i32
    %c0_i32_1 = arith.constant 0 : i32
    return %c0_i32, %c0_i32_0 : i32, i32
  }
  func.func @transform_3(%arg0: i32) -> (i32, i32) {
    %c0_i32 = arith.constant 0 : i32
    %c0_i32_0 = arith.constant 0 : i32
    return %arg0, %c0_i32 : i32, i32
  }
}

</mosaic_0001>

<bundles_post_ra>
// kernel: tpu_custom_call.1
= control target key start
LH: loop header
LB: loop body
LE: loop exit
PB: predicated region body
PF: predicated region fallthrough
CT: control target
= control target key end

     0   :  { %s1983_s12 = smov 0   ;;  %s2243_s0 = inlined_call_operand.vmem [shape: f32[2,10,10,4], index: 0, kind: input, shape index: {}]   ;;  %s2244_s1 = inlined_call_operand.vmem [shape: f32[9,4,8], index: 1, kind: input, shape index: {}]   ;;  %s2245_s2 = inlined_call_operand.vmem [shape: f32[1,8], index: 2, kind: input, shape index: {}]   ;;  %s2246_s3 = inlined_call_operand.vmem [shape: f32[128,8], index: 3, kind: output, shape index: {}]  }
   0x1 LB: > { %s1989_s13 = sadd.s32 4294967295, %s1961_s12   ;;  %p1593_p0 = scmp.ge.s32.totalorder %s1961_s12, 1  ;;  %s1961_s12 = sphi %s1983_s12, %s13_s12  }
   0x2   : > { %p137_p1 = scmp.lt.s32.totalorder %s1961_s12, 3 }
   0x4   : > { %p138_p2 = pnand %p1593_p0, %p137_p1 }
   0x5   : > { %p161_p3 = scmp.lt.s32.totalorder (!%p138_p2), %s1989_s13, 1  ;;  %s1595_s10 = sshll.u32 (!%p138_p2), %s1989_s13, 3 }
   0x6   : > { %141 = sbr.rel (%p138_p2) target bundleno = 289 (0x121), region = 32  ;;  %p2203_p4 = scmp.lt.s32.totalorder (!%p138_p2), %s1595_s10, 15 }
   0xb   : > { %v1597_v0 = vld [vmem:[%s2244_s1 + $0x4] sm:$0xf]  ;;  %vm216_vm0 = vcmask 1043456   ;;  %v180_v1 = vld [vmem:[%s2244_s1] sm:$0xf]  ;;  %s162_s20 = scalar_select %p161_p3, %s1989_s13, 1 }
   0xc   : > { %1944 = vmatprep.subr.msk.mxu1 %vm216_vm0, %v1597_v0  ;;  %1818 = vmatprep.subr.msk.mxu0 %vm216_vm0, %v1597_v0  ;;  %v1616_v2 = vld [vmem:[%s2244_s1 + $0x8] sm:$0xf]  ;;  %vm191_vm1 = vcmask 31744   ;;  %v1634_v9 = vld [vmem:[%s2244_s1 + $0xc] sm:$0xf]  ;;  %s2249_s10 = smov (!%p2203_p4, %s1595_s10), 15 }
   0xd   : > { %1945 = vmatpush3.msk.msra.mxu1 %vm216_vm0, %v1597_v0  ;;  %1819 = vmatpush3.msk.msra.mxu0 %vm216_vm0, %v1597_v0  ;;  %s1946_s21 = smul.u32 160, %s162_s20  ;;  %v1652_v10 = vld [vmem:[%s2244_s1 + $0x10] sm:$0xf]  ;;  %v1670_v19 = vld [vmem:[%s2244_s1 + $0x14] sm:$0xf]  ;;  %s1596_s13 = sshll.u32 %s2249_s10, 3 }
   0xe   : > { %1832 = vmatprep.subr.msk.mxu1 %vm216_vm0, %v180_v1  ;;  %1846 = vmatprep.subr.msk.mxu0 %vm216_vm0, %v1616_v2  ;;  %v1688_v20 = vld [vmem:[%s2244_s1 + $0x18] sm:$0xf]  ;;  %v1706_v31 = vld [vmem:[%s2244_s1 + $0x1c] sm:$0xf]  ;;  %v1724_v32 = vld [vmem:[%s2244_s1 + $0x20] sm:$0xf]  ;;  %s2221_s18 = scalar_lea.vmem %s2246_s3, %s1596_s13 }
   0xf   : > { %s2013_s24 = scalar_lea.vmem %s2243_s0, %s1946_s21  ;;  %vm1524_vm2 = vcmask 64512  }
  0x10   : > { %v181_v3 = vld [vmem:[%s2013_s24 + $0x1] sm:$0xff]  ;;  %v182_v5 = vld [vmem:[%s2013_s24 + $0x11] sm:$0xff] }
  0x11   : > { %v2017_v4 = vld [vmem:[%s2013_s24 + $0x41] sm:$0xff]  ;;  %1820 = vmatprep.mubr.msk.f32.mxu0 %vm191_vm1, %v181_v3  ;;  %v2024_v6 = vld [vmem:[%s2013_s24 + $0x51] sm:$0xff] }
  0x12   : > { %1826 = vmatprep.mubr.msk.f32.mxu1 %vm191_vm1, %v2017_v4  ;;  %v2027_v7 = vld [vmem:[%s2013_s24 + $0x21] sm:$0xff]  ;;  %1821 = vmatmul.mubr.msk.f32.vlgmr.msra.gmra.mxu0 %vm191_vm1, %v182_v5  ;;  %v2044_v11 = vld [vmem:[%s2013_s24 + $0x31] sm:$0xff] }
  0x13   : > { %v2030_v8 = vld [vmem:[%s2013_s24 + $0x61] sm:$0xff]  ;;  %1827 = vmatmul.mubr.msk.f32.vlgmr.msra.gmra.mxu1 %vm191_vm1, %v2024_v6  ;;  %1847 = vmatpush3.msk.msra.mxu0 %vm216_vm0, %v1616_v2  ;;  %v2047_v12 = vld [vmem:[%s2013_s24 + $0x71] sm:$0xff] }
  0x14   : > { %1833 = vmatpush3.msk.msra.mxu1 %vm216_vm0, %v180_v1  ;;  %1823 = vmatprep.mubr.msk.f32.mxu0 %vm191_vm1, %v2027_v7  ;;  %v172_v13 = vld [vmem:[%s2013_s24] sm:$0xff]  ;;  %v173_v15 = vld [vmem:[%s2013_s24 + $0x10] sm:$0xff] }
  0x15   : > { %1829 = vmatprep.mubr.msk.f32.mxu1 %vm191_vm1, %v2030_v8  ;;  %v457_v14 = vld [vmem:[%s2013_s24 + $0x2] sm:$0xff]  ;;  %1860 = vmatprep.subr.msk.mxu1 %vm216_vm0, %v1634_v9  ;;  %v458_v16 = vld [vmem:[%s2013_s24 + $0x12] sm:$0xff] }
  0x16   : > { %1874 = vmatprep.subr.msk.mxu0 %vm216_vm0, %v1652_v10  ;;  %1824 = vmatmul.mubr.msk.f32.gmra.mxu0 %vm191_vm1, %v2044_v11  ;;  %v174_v17 = vld [vmem:[%s2013_s24 + $0x20] sm:$0xff]  ;;  %v175_v21 = vld [vmem:[%s2013_s24 + $0x30] sm:$0xff] }
  0x17   : > { %1830 = vmatmul.mubr.msk.f32.gmra.mxu1 %vm191_vm1, %v2047_v12  ;;  %1848 = vmatprep.mubr.msk.f32.mxu0 %vm191_vm1, %v457_v14  ;;  %v2067_v18 = vld [vmem:[%s2013_s24 + $0x22] sm:$0xff]  ;;  %v2081_v22 = vld [vmem:[%s2013_s24 + $0x32] sm:$0xff] }
  0x18   : > { %1834 = vmatprep.mubr.msk.f32.mxu1 %vm191_vm1, %v172_v13  ;;  %v176_v23 = vld [vmem:[%s2013_s24 + $0x40] sm:$0xff]  ;;  %v177_v25 = vld [vmem:[%s2013_s24 + $0x50] sm:$0xff] }
  0x19   : > { %v2088_v24 = vld [vmem:[%s2013_s24 + $0x42] sm:$0xff]  ;;  %v462_v26 = vld [vmem:[%s2013_s24 + $0x52] sm:$0xff] }
  0x1a   : > { %1849 = vmatmul.mubr.msk.f32.vlgmr.msra.gmra.mxu0 %vm191_vm1, %v458_v16  ;;  %v178_v27 = vld [vmem:[%s2013_s24 + $0x60] sm:$0xff]  ;;  %v179_v29 = vld [vmem:[%s2013_s24 + $0x70] sm:$0xff] }
  0x1b   : > { %1835 = vmatmul.mubr.msk.f32.vlgmr.msra.gmra.mxu1 %vm191_vm1, %v173_v15  ;;  %1875 = vmatpush3.msk.msra.mxu0 %vm216_vm0, %v1652_v10  ;;  %v463_v28 = vld [vmem:[%s2013_s24 + $0x62] sm:$0xff]  ;;  %v464_v30 = vld [vmem:[%s2013_s24 + $0x72] sm:$0xff] }
  0x1c   : > { %1861 = vmatpush3.msk.msra.mxu1 %vm216_vm0, %v1634_v9  ;;  %1837 = vmatprep.mubr.msk.f32.mxu1 %vm191_vm1, %v174_v17  ;;  %v1633_v33 = vld [vmem:[%s2013_s24 + $0x80] sm:$0xff]  ;;  %v1687_v36 = vld [vmem:[%s2013_s24 + $0x90] sm:$0xff] }
  0x1d   : > { %1851 = vmatprep.mubr.msk.f32.mxu0 %vm191_vm1, %v2067_v18  ;;  %1888 = vmatprep.subr.msk.mxu1 %vm216_vm0, %v1670_v19  ;;  %v1651_v34 = vld [vmem:[%s2013_s24 + $0x81] sm:$0xff]  ;;  %v1705_v37 = vld [vmem:[%s2013_s24 + $0x91] sm:$0xff] }
  0x1e   : > { %1902 = vmatprep.subr.msk.mxu0 %vm216_vm0, %v1688_v20  ;;  %1852 = vmatmul.mubr.msk.f32.gmra.mxu0 %vm191_vm1, %v2081_v22  ;;  %v1669_v35 = vld [vmem:[%s2013_s24 + $0x82] sm:$0xff]  ;;  %v1723_v38 = vld [vmem:[%s2013_s24 + $0x92] sm:$0xff] }
  0x1f   : > { %1838 = vmatmul.mubr.msk.f32.gmra.mxu1 %vm191_vm1, %v175_v21  ;;  %1854 = vmatprep.mubr.msk.f32.mxu0 %vm191_vm1, %v2088_v24 }
  0x20   : > { %1840 = vmatprep.mubr.msk.f32.mxu1 %vm191_vm1, %v176_v23 }
  0x22   : > { %1855 = vmatmul.mubr.msk.f32.gmra.mxu0 %vm191_vm1, %v462_v26 }
  0x23   : > { %1841 = vmatmul.mubr.msk.f32.gmra.mxu1 %vm191_vm1, %v177_v25  ;;  %1857 = vmatprep.mubr.msk.f32.mxu0 %vm191_vm1, %v463_v28 }
  0x24   : > { %1843 = vmatprep.mubr.msk.f32.mxu1 %vm191_vm1, %v178_v27 }
  0x26   : > { %1858 = vmatmul.mubr.msk.f32.gmra.mxu0 %vm191_vm1, %v464_v30 }
  0x27   : > { %1844 = vmatmul.mubr.msk.f32.gmra.mxu1 %vm191_vm1, %v179_v29  ;;  %1876 = vmatprep.mubr.msk.f32.mxu0 %vm191_vm1, %v182_v5 }
  0x28   : > { %1862 = vmatprep.mubr.msk.f32.mxu1 %vm191_vm1, %v173_v15 }
  0x2a   : > { %1877 = vmatmul.mubr.msk.f32.vlgmr.msra.gmra.mxu0 %vm191_vm1, %v2027_v7 }
  0x2b   : > { %1863 = vmatmul.mubr.msk.f32.vlgmr.msra.gmra.mxu1 %vm191_vm1, %v174_v17  ;;  %1903 = vmatpush3.msk.msra.mxu0 %vm216_vm0, %v1688_v20 }
  0x2c   : > { %1889 = vmatpush3.msk.msra.mxu1 %vm216_vm0, %v1670_v19  ;;  %1865 = vmatprep.mubr.msk.f32.mxu1 %vm191_vm1, %v175_v21 }
  0x2d   : > { %1879 = vmatprep.mubr.msk.f32.mxu0 %vm191_vm1, %v2044_v11  ;;  %1916 = vmatprep.subr.msk.mxu1 %vm216_vm0, %v1706_v31 }
  0x2e   : > { %1930 = vmatprep.subr.msk.mxu0 %vm216_vm0, %v1724_v32  ;;  %1880 = vmatmul.mubr.msk.f32.gmra.mxu0 %vm191_vm1, %v2017_v4 }
  0x2f   : > { %1866 = vmatmul.mubr.msk.f32.gmra.mxu1 %vm191_vm1, %v176_v23  ;;  %1882 = vmatprep.mubr.msk.f32.mxu0 %vm191_vm1, %v2024_v6 }
  0x30   : > { %1868 = vmatprep.mubr.msk.f32.mxu1 %vm191_vm1, %v177_v25 }
  0x32   : > { %1883 = vmatmul.mubr.msk.f32.gmra.mxu0 %vm191_vm1, %v2030_v8 }
  0x33   : > { %1869 = vmatmul.mubr.msk.f32.gmra.mxu1 %vm191_vm1, %v178_v27  ;;  %1885 = vmatprep.mubr.msk.f32.mxu0 %vm191_vm1, %v2047_v12 }
  0x34   : > { %1871 = vmatprep.mubr.msk.f32.mxu1 %vm191_vm1, %v179_v29 }
  0x36   : > { %1886 = vmatmul.mubr.msk.f32.gmra.mxu0 %vm191_vm1, %v1651_v34 }
  0x37   : > { %1872 = vmatmul.mubr.msk.f32.gmra.mxu1 %vm191_vm1, %v1633_v33  ;;  %1904 = vmatprep.mubr.msk.f32.mxu0 %vm191_vm1, %v174_v17 }
  0x38   : > { %1890 = vmatprep.mubr.msk.f32.mxu1 %vm191_vm1, %v458_v16 }
  0x3a   : > { %1905 = vmatmul.mubr.msk.f32.vlgmr.msra.gmra.mxu0 %vm191_vm1, %v175_v21 }
  0x3b   : > { %1891 = vmatmul.mubr.msk.f32.vlgmr.msra.gmra.mxu1 %vm191_vm1, %v2067_v18  ;;  %1931 = vmatpush3.msk.msra.mxu0 %vm216_vm0, %v1724_v32 }
  0x3c   : > { %1917 = vmatpush3.msk.msra.mxu1 %vm216_vm0, %v1706_v31  ;;  %1893 = vmatprep.mubr.msk.f32.mxu1 %vm191_vm1, %v2081_v22 }
  0x3d   : > { %1907 = vmatprep.mubr.msk.f32.mxu0 %vm191_vm1, %v176_v23 }
  0x3e   : > { %1908 = vmatmul.mubr.msk.f32.gmra.mxu0 %vm191_vm1, %v177_v25 }
  0x3f   : > { %1894 = vmatmul.mubr.msk.f32.gmra.mxu1 %vm191_vm1, %v2088_v24  ;;  %1910 = vmatprep.mubr.msk.f32.mxu0 %vm191_vm1, %v178_v27 }
  0x40   : > { %1896 = vmatprep.mubr.msk.f32.mxu1 %vm191_vm1, %v462_v26 }
  0x42   : > { %1911 = vmatmul.mubr.msk.f32.gmra.mxu0 %vm191_vm1, %v179_v29 }
  0x43   : > { %1897 = vmatmul.mubr.msk.f32.gmra.mxu1 %vm191_vm1, %v463_v28  ;;  %1913 = vmatprep.mubr.msk.f32.mxu0 %vm191_vm1, %v1633_v33 }
  0x44   : > { %1899 = vmatprep.mubr.msk.f32.mxu1 %vm191_vm1, %v464_v30 }
  0x46   : > { %1914 = vmatmul.mubr.msk.f32.gmra.mxu0 %vm191_vm1, %v1687_v36 }
  0x47   : > { %1900 = vmatmul.mubr.msk.f32.gmra.mxu1 %vm191_vm1, %v1669_v35  ;;  %1932 = vmatprep.mubr.msk.f32.mxu0 %vm191_vm1, %v2067_v18 }
  0x48   : > { %1918 = vmatprep.mubr.msk.f32.mxu1 %vm191_vm1, %v2027_v7 }
  0x4a   : > { %1933 = vmatmul.mubr.msk.f32.vlgmr.msra.gmra.mxu0 %vm191_vm1, %v2081_v22 }
  0x4b   : > { %1919 = vmatmul.mubr.msk.f32.vlgmr.msra.gmra.mxu1 %vm191_vm1, %v2044_v11  ;;  %1935 = vmatprep.mubr.msk.f32.mxu0 %vm191_vm1, %v2088_v24 }
  0x4c   : > { %1921 = vmatprep.mubr.msk.f32.mxu1 %vm191_vm1, %v2017_v4 }
  0x4e   : > { %1936 = vmatmul.mubr.msk.f32.gmra.mxu0 %vm191_vm1, %v462_v26 }
  0x4f   : > { %1922 = vmatmul.mubr.msk.f32.gmra.mxu1 %vm191_vm1, %v2024_v6  ;;  %1938 = vmatprep.mubr.msk.f32.mxu0 %vm191_vm1, %v463_v28 }
  0x50   : > { %1924 = vmatprep.mubr.msk.f32.mxu1 %vm191_vm1, %v2030_v8 }
  0x52   : > { %1939 = vmatmul.mubr.msk.f32.gmra.mxu0 %vm191_vm1, %v464_v30 }
  0x53   : > { %1925 = vmatmul.mubr.msk.f32.gmra.mxu1 %vm191_vm1, %v2047_v12  ;;  %1941 = vmatprep.mubr.msk.f32.mxu0 %vm191_vm1, %v1669_v35 }
  0x54   : > { %1927 = vmatprep.mubr.msk.f32.mxu1 %vm191_vm1, %v1651_v34 }
  0x56   : > { %1942 = vmatmul.mubr.msk.f32.gmra.mxu0 %vm191_vm1, %v1723_v38 }
  0x57   : > { %1928 = vmatmul.mubr.msk.f32.gmra.mxu1 %vm191_vm1, %v1705_v37 }
  0xd2   : > { %v1822_v39 = vpop.f32.mrf.mxu0 }
  0xd3   : > { %v1828_v40 = vpop.f32.mrf.mxu1 }
  0xd4   : > { %v286_v41 = vpop.f32.mrf.mxu0 }
  0xd5   : > { %v306_v42 = vpop.f32.mrf.mxu1 }
  0xd6   : > { %v1825_v43 = vpop.f32.mrf.mxu0 }
  0xd7   : > { %v1831_v44 = vpop.f32.mrf.mxu1 }
  0xd8   : > { %v296_v45 = vpop.f32.mrf.mxu0 }
  0xd9   : > { %v2194_v46 = vpop.f32.mrf.mxu1 }
  0xda   : > { %v1850_v48 = vpop.f32.mrf.mxu0 }
  0xdb   : > { %v1836_v47 = vpop.f32.mrf.mxu1 }
  0xdc   : > { %v560_v50 = vpop.f32.mrf.mxu0  ;;  %v424_v15 = vadd.f32 %v1836_v47, %v1822_v39 }
  0xdd   : > { %v418_v49 = vpop.f32.mrf.mxu1 }
  0xde   : > { %v1853_v52 = vpop.f32.mrf.mxu0  ;;  %v419_v18 = vadd.f32 %v418_v49, %v286_v41  ;;  %v600_v21 = vadd.f32 %v1850_v48, %v424_v15 }
  0xdf   : > { %v1839_v51 = vpop.f32.mrf.mxu1 }
  0xe0   : > { %v570_v54 = vpop.f32.mrf.mxu0  ;;  %v434_v22 = vadd.f32 %v1839_v51, %v1825_v43  ;;  %v599_v25 = vadd.f32 %v560_v50, %v419_v18 }
  0xe1   : > { %v428_v53 = vpop.f32.mrf.mxu1 }
  0xe2   : > { %v1856_v56 = vpop.f32.mrf.mxu0  ;;  %v429_v26 = vadd.f32 %v428_v53, %v296_v45  ;;  %v602_v31 = vadd.f32 %v1853_v52, %v434_v22 }
  0xe3   : > { %v1842_v55 = vpop.f32.mrf.mxu1 }
  0xe4   : > { %v580_v58 = vpop.f32.mrf.mxu0  ;;  %v444_v28 = vadd.f32 %v1842_v55, %v1828_v40  ;;  %v601_v36 = vadd.f32 %v570_v54, %v429_v26 }
  0xe5   : > { %v438_v57 = vpop.f32.mrf.mxu1 }
  0xe6   : > { %v1859_v60 = vpop.f32.mrf.mxu0  ;;  %v439_v33 = vadd.f32 %v438_v57, %v306_v42  ;;  %v604_v39 = vadd.f32 %v1856_v56, %v444_v28 }
  0xe7   : > { %v1845_v59 = vpop.f32.mrf.mxu1 }
  0xe8   : > { %v2196_v62 = vpop.f32.mrf.mxu0  ;;  %v454_v41 = vadd.f32 %v1845_v59, %v1831_v44  ;;  %v603_v49 = vadd.f32 %v580_v58, %v439_v33 }
  0xe9   : > { %v448_v61 = vpop.f32.mrf.mxu1 }
  0xea   : > { %v1878_v0 = vpop.f32.mrf.mxu0  ;;  %v449_v42 = vadd.f32 %v448_v61, %v2194_v46  ;;  %v606_v55 = vadd.f32 %v1859_v60, %v454_v41  ;;  %v1734_v60 = vld [vmem:[%s2245_s2] ss:$0 sm:$0xff] }
  0xeb   : > { %v1864_v63 = vpop.f32.mrf.mxu1 }
  0xec   : > { %v861_v2 = vpop.f32.mrf.mxu0  ;;  %v751_v27 = vadd.f32 %v1864_v63, %v600_v21  ;;  %v605_v58 = vadd.f32 %v2196_v62, %v449_v42 }
  0xed   : > { %v711_v1 = vpop.f32.mrf.mxu1 }
  0xee   : > { %v1881_v4 = vpop.f32.mrf.mxu0  ;;  %v750_v32 = vadd.f32 %v711_v1, %v599_v25  ;;  %v901_v37 = vadd.f32 %v1878_v0, %v751_v27 }
  0xef   : > { %v1867_v3 = vpop.f32.mrf.mxu1 }
  0xf0   : > { %v871_v6 = vpop.f32.mrf.mxu0  ;;  %v753_v38 = vadd.f32 %v1867_v3, %v602_v31  ;;  %v900_v45 = vadd.f32 %v861_v2, %v750_v32 }
  0xf1   : > { %v721_v5 = vpop.f32.mrf.mxu1 }
  0xf2   : > { %v1884_v8 = vpop.f32.mrf.mxu0  ;;  %v752_v47 = vadd.f32 %v721_v5, %v601_v36  ;;  %v903_v53 = vadd.f32 %v1881_v4, %v753_v38 }
  0xf3   : > { %v1870_v7 = vpop.f32.mrf.mxu1 }
  0xf4   : > { %v881_v10 = vpop.f32.mrf.mxu0  ;;  %v755_v50 = vadd.f32 %v1870_v7, %v604_v39  ;;  %v902_v59 = vadd.f32 %v871_v6, %v752_v47 }
  0xf5   : > { %v731_v9 = vpop.f32.mrf.mxu1 }
  0xf6   : > { %v2198_v12 = vpop.f32.mrf.mxu0  ;;  %v754_v56 = vadd.f32 %v731_v9, %v603_v49  ;;  %v905_v1 = vadd.f32 %v1884_v8, %v755_v50 }
  0xf7   : > { %v1873_v11 = vpop.f32.mrf.mxu1 }
  0xf8   : > { %v2200_v14 = vpop.f32.mrf.mxu0  ;;  %v757_v46 = vadd.f32 %v1873_v11, %v606_v55  ;;  %v904_v7 = vadd.f32 %v881_v10, %v754_v56 }
  0xf9   : > { %v741_v13 = vpop.f32.mrf.mxu1 }
  0xfa   : > { %v1906_v17 = vpop.f32.mrf.mxu0  ;;  %v756_v15 = vadd.f32 %v741_v13, %v605_v58  ;;  %v907_v8 = vadd.f32 %v2198_v12, %v757_v46 }
  0xfb   : > { %v1892_v16 = vpop.f32.mrf.mxu1 }
  0xfc   : > { %v1162_v20 = vpop.f32.mrf.mxu0  ;;  %v1051_v48 = vadd.f32 %v1892_v16, %v901_v37 }
  0xfd   : > { %v1011_v19 = vpop.f32.mrf.mxu1 }
  0xfe   : > { %v1909_v24 = vpop.f32.mrf.mxu0  ;;  %v1050_v54 = vadd.f32 %v1011_v19, %v900_v45  ;;  %v1202_v63 = vadd.f32 %v1906_v17, %v1051_v48 }
  0xff   : > { %v1895_v23 = vpop.f32.mrf.mxu1 }
 0x100   : > { %v1172_v30 = vpop.f32.mrf.mxu0  ;;  %v1053_v0 = vadd.f32 %v1895_v23, %v903_v53  ;;  %v1201_v3 = vadd.f32 %v1162_v20, %v1050_v54  ;;  %v906_v23 = vadd.f32 %v2200_v14, %v756_v15 }
 0x101   : > { %v1021_v29 = vpop.f32.mrf.mxu1 }
 0x102   : > { %v1912_v35 = vpop.f32.mrf.mxu0  ;;  %v1052_v4 = vadd.f32 %v1021_v29, %v902_v59  ;;  %v1204_v17 = vadd.f32 %v1909_v24, %v1053_v0 }
 0x103   : > { %v1898_v34 = vpop.f32.mrf.mxu1 }
 0x104   : > { %v1182_v40 = vpop.f32.mrf.mxu0  ;;  %v1055_v16 = vadd.f32 %v1898_v34, %v905_v1  ;;  %v1203_v19 = vadd.f32 %v1172_v30, %v1052_v4 }
 0x105   : > { %v1031_v43 = vpop.f32.mrf.mxu1 }
 0x106   : > { %v1915_v52 = vpop.f32.mrf.mxu0  ;;  %v1054_v11 = vadd.f32 %v1031_v43, %v904_v7  ;;  %v1206_v24 = vadd.f32 %v1912_v35, %v1055_v16 }
 0x107   : > { %v1901_v51 = vpop.f32.mrf.mxu1 }
 0x108   : > { %v1192_v57 = vpop.f32.mrf.mxu0  ;;  %v1057_v26 = vadd.f32 %v1901_v51, %v907_v8  ;;  %v1205_v31 = vadd.f32 %v1182_v40, %v1054_v11 }
 0x109   : > { %v1041_v44 = vpop.f32.mrf.mxu1 }
 0x10a   : > { %v1934_v2 = vpop.f32.mrf.mxu0  ;;  %v1056_v30 = vadd.f32 %v1041_v44, %v906_v23  ;;  %v1208_v38 = vadd.f32 %v1915_v52, %v1057_v26 }
 0x10b   : > { %v1920_v61 = vpop.f32.mrf.mxu1 }
 0x10c   : > { %v1352_v5 = vadd.f32 %v1920_v61, %v1202_v63  ;;  %v1462_v9 = vpop.f32.mrf.mxu0  ;;  %v1207_v47 = vadd.f32 %v1192_v57, %v1056_v30 }
 0x10d   : > { %v1312_v6 = vpop.f32.mrf.mxu1 }
 0x10e   : > { %v1502_v18 = vadd.f32 %v1934_v2, %v1352_v5  ;;  %v1351_v62 = vadd.f32 %v1312_v6, %v1201_v3  ;;  %v1937_v13 = vpop.f32.mrf.mxu0 }
 0x10f   : > { %v1923_v10 = vpop.f32.mrf.mxu1 }
 0x110   : > { %v1517_v20 = vadd.f32 %v1734_v60, %v1502_v18  ;;  %v1501_v21 = vadd.f32 %v1462_v9, %v1351_v62  ;;  %v1354_v22 = vadd.f32 %v1923_v10, %v1204_v17  ;;  %v1472_v12 = vpop.f32.mrf.mxu0 }
 0x111   : > { %v1322_v25 = vpop.f32.mrf.mxu1 }
 0x112   : > { %1526 = vst.msk [vmem:[%s2221_s18 + $0x8] sm:$0xff] %vm1524_vm2, %v1517_v20  ;;  %v1516_v27 = vadd.f32 %v1734_v60, %v1501_v21  ;;  %v1504_v28 = vadd.f32 %v1937_v13, %v1354_v22  ;;  %v1353_v29 = vadd.f32 %v1322_v25, %v1203_v19  ;;  %v1940_v33 = vpop.f32.mrf.mxu0 }
 0x113   : > { %v1926_v32 = vpop.f32.mrf.mxu1 }
 0x114   : > { %1525 = vst.msk [vmem:[%s2221_s18] sm:$0xff] %vm1524_vm2, %v1516_v27  ;;  %v1519_v34 = vadd.f32 %v1734_v60, %v1504_v28  ;;  %v1503_v36 = vadd.f32 %v1472_v12, %v1353_v29  ;;  %v1356_v14 = vadd.f32 %v1926_v32, %v1206_v24  ;;  %v1482_v37 = vpop.f32.mrf.mxu0 }
 0x115   : > { %v1332_v35 = vpop.f32.mrf.mxu1 }
 0x116   : > { %1528 = vst.msk [vmem:[%s2221_s18 + $0x18] sm:$0xff] %vm1524_vm2, %v1519_v34  ;;  %v1518_v39 = vadd.f32 %v1734_v60, %v1503_v36  ;;  %v1506_v41 = vadd.f32 %v1940_v33, %v1356_v14  ;;  %v1355_v43 = vadd.f32 %v1332_v35, %v1205_v31  ;;  %v1943_v45 = vpop.f32.mrf.mxu0 }
 0x117   : > { %v1929_v40 = vpop.f32.mrf.mxu1 }
 0x118   : > { %1527 = vst.msk [vmem:[%s2221_s18 + $0x10] sm:$0xff] %vm1524_vm2, %v1518_v39  ;;  %v1521_v48 = vadd.f32 %v1734_v60, %v1506_v41  ;;  %v1505_v49 = vadd.f32 %v1482_v37, %v1355_v43  ;;  %v1358_v42 = vadd.f32 %v1929_v40, %v1208_v38  ;;  %v1492_v54 = vpop.f32.mrf.mxu0 }
 0x119   : > { %v1342_v50 = vpop.f32.mrf.mxu1 }
 0x11a   : > { %1530 = vst.msk [vmem:[%s2221_s18 + $0x28] sm:$0xff] %vm1524_vm2, %v1521_v48  ;;  %v1520_v51 = vadd.f32 %v1734_v60, %v1505_v49  ;;  %v1508_v52 = vadd.f32 %v1943_v45, %v1358_v42  ;;  %v1357_v53 = vadd.f32 %v1342_v50, %v1207_v47 }
 0x11c   : > { %1529 = vst.msk [vmem:[%s2221_s18 + $0x20] sm:$0xff] %vm1524_vm2, %v1520_v51  ;;  %v1523_v55 = vadd.f32 %v1734_v60, %v1508_v52  ;;  %v1507_v56 = vadd.f32 %v1492_v54, %v1357_v53 }
 0x11e   : > { %1532 = vst.msk [vmem:[%s2221_s18 + $0x38] sm:$0xff] %vm1524_vm2, %v1523_v55  ;;  %v1522_v44 = vadd.f32 %v1734_v60, %v1507_v56 }
 0x120   : > { %1531 = vst.msk [vmem:[%s2221_s18 + $0x30] sm:$0xff] %vm1524_vm2, %v1522_v44 }
 0x121 PF: > { %s13_s12 = sadd.s32 1, %s1961_s12  }
 0x122   : > { %p10_p5 = scmp.ge.s32.totalorder %s13_s12, 4  }
 0x124   :  { %12 = sbr.rel (!%p10_p5) target bundleno = 1 (0x1), region = 72 }

</bundles_post_ra>
